<compile_context>
chip_gen: v7x
topology: tpu7x:2x2x1
jax: 0.10.0
libtpu: 0.0.40
codegen_flags: <defaults>
</compile_context>

<pallas_src>
import functools

import jax
import jax.numpy as jnp
from jax.experimental import pallas as pl
from jax.experimental.pallas import tpu as pltpu


# --------------------------- Pallas kernels ---------------------------------
def _conv_stats_kernel(patches_ref, w_ref, b_ref, o_ref, stats_ref, *,
                       nhw, tm, mask_rows):
    """Pass 1: tiled conv GEMM (K = 9*Cin) + per-channel sum / sumsq."""
    i = pl.program_id(0)

    # Single MXU GEMM per tile; accumulate in f32 regardless of input dtype.
    acc = jnp.dot(patches_ref[...], w_ref[...],
                  preferred_element_type=jnp.float32)
    acc = acc + b_ref[...]                      # (1, Cout_p) bias broadcast
    o_ref[...] = acc                            # raw (pre-BN) activation tile

    # Keep rows past the true N*H*W (zero-padded tiles) out of the statistics.
    if mask_rows:
        rows = i * tm + jax.lax.broadcasted_iota(jnp.int32, (tm, 1), 0)
        acc = jnp.where(rows < nhw, acc, 0.0)

    @pl.when(i == 0)
    def _init():
        stats_ref[...] = jnp.zeros_like(stats_ref)

    stats_ref[0:1, :] += jnp.sum(acc, axis=0, keepdims=True)
    stats_ref[1:2, :] += jnp.sum(acc * acc, axis=0, keepdims=True)


def _bn_relu_kernel(x_ref, scale_ref, shift_ref, o_ref):
    """Pass 2: y = max(x * scale + shift, 0) with per-channel scale/shift."""
    o_ref[...] = jnp.maximum(x_ref[...] * scale_ref[...] + shift_ref[...], 0.0)


# ------------------------------ wrappers -------------------------------------
def _round_up(x, m):
    return (x + m - 1) // m * m


def _im2col_folded(x_nhwc):
    """(N,H,W,C) -> (N*H*W, 9*C), tap-major / channel-minor ordering."""
    n, h, w, c = x_nhwc.shape
    xp = jnp.pad(x_nhwc, ((0, 0), (1, 1), (1, 1), (0, 0)))
    taps = [xp[:, dy:dy + h, dx:dx + w, :] for dy in range(3) for dx in range(3)]
    return jnp.concatenate(taps, axis=-1).reshape(n * h * w, 9 * c)


def _pick_tm(row_in_bytes, row_out_bytes, budget_bytes=8 << 20):
    """Largest power-of-two row tile whose double-buffered tiles fit budget."""
    tm = 256
    while tm > 8 and tm * 2 * (row_in_bytes + row_out_bytes) > budget_bytes:
        tm //= 2
    return tm


def conv_bn_relu(x_nhwc, w_oihw, bias, gamma, beta, *,
                 gemm_dtype=jnp.bfloat16, eps=1e-5):
    n, h, w, cin = x_nhwc.shape
    cout = w_oihw.shape[0]
    k = 9 * cin
    cout_p = _round_up(cout, 128)               # lane-dense output stores
    nhw = n * h * w

    gemm_bytes = jnp.dtype(gemm_dtype).itemsize
    tm = _pick_tm(k * gemm_bytes, cout_p * 4)
    nhw_pad = _round_up(nhw, tm)
    grid = (nhw_pad // tm,)

    # ---- glue (XLA): folded im2col, tap-major weights, channel padding ----
    patches = _im2col_folded(x_nhwc).astype(gemm_dtype)          # (NHW, 9*Cin)
    if nhw_pad != nhw:
        patches = jnp.pad(patches, ((0, nhw_pad - nhw), (0, 0)))
    w2d = jnp.transpose(w_oihw, (2, 3, 1, 0)).reshape(k, cout)   # (9*Cin, Cout)
    w2d = jnp.pad(w2d, ((0, 0), (0, cout_p - cout))).astype(gemm_dtype)
    b2d = jnp.pad(bias, (0, cout_p - cout)).reshape(1, cout_p).astype(jnp.float32)

    # ---- pass 1: tiled conv GEMM + global per-channel sum / sumsq ----
    conv_raw, stats = pl.pallas_call(
        functools.partial(_conv_stats_kernel, nhw=nhw, tm=tm,
                          mask_rows=(nhw_pad != nhw)),
        out_shape=(jax.ShapeDtypeStruct((nhw_pad, cout_p), jnp.float32),
                   jax.ShapeDtypeStruct((2, cout_p), jnp.float32)),
        grid=grid,
        in_specs=[
            pl.BlockSpec((tm, k), lambda i: (i, 0)),       # patches rows
            pl.BlockSpec((k, cout_p), lambda i: (0, 0)),   # weights (resident)
            pl.BlockSpec((1, cout_p), lambda i: (0, 0)),   # bias    (resident)
        ],
        out_specs=(
            pl.BlockSpec((tm, cout_p), lambda i: (i, 0)),  # raw conv tiles
            pl.BlockSpec((2, cout_p), lambda i: (0, 0)),   # stats accumulator
        ),
        compiler_params=pltpu.CompilerParams(
            dimension_semantics=("arbitrary",)),           # stats accumulate
        cost_estimate=pl.CostEstimate(
            flops=2 * nhw_pad * k * cout_p,
            transcendentals=0,
            bytes_accessed=(nhw_pad * k * gemm_bytes
                            + k * cout_p * gemm_bytes
                            + nhw_pad * cout_p * 4)),
    )(patches, w2d, b2d)

    # ---- glue: fold global batch stats + affine into per-channel scale/shift
    mean = stats[0] / nhw
    var = jnp.maximum(stats[1] / nhw - mean * mean, 0.0)
    inv = jax.lax.rsqrt(var + eps)
    gamma_p = jnp.pad(gamma, (0, cout_p - cout)).astype(jnp.float32)
    beta_p = jnp.pad(beta, (0, cout_p - cout)).astype(jnp.float32)
    scale = (gamma_p * inv).reshape(1, cout_p)
    shift = (beta_p - mean * gamma_p * inv).reshape(1, cout_p)

    # ---- pass 2: apply BatchNorm affine + ReLU, tile-parallel ----
    y = pl.pallas_call(
        _bn_relu_kernel,
        out_shape=jax.ShapeDtypeStruct((nhw_pad, cout_p), jnp.float32),
        grid=grid,
        in_specs=[
            pl.BlockSpec((tm, cout_p), lambda i: (i, 0)),
            pl.BlockSpec((1, cout_p), lambda i: (0, 0)),
            pl.BlockSpec((1, cout_p), lambda i: (0, 0)),
        ],
        out_specs=pl.BlockSpec((tm, cout_p), lambda i: (i, 0)),
        compiler_params=pltpu.CompilerParams(
            dimension_semantics=("parallel",)),
    )(conv_raw, scale, shift)

    return y[:nhw, :cout].reshape(n, h, w, cout)


def double_cov(x_nchw, params, *, gemm_dtype=jnp.bfloat16):
    """Forward of DoubleCov. Input/output NCHW (PyTorch convention)."""
    x = jnp.transpose(x_nchw, (0, 2, 3, 1))  # NCHW -> NHWC
    y = conv_bn_relu(x, params["w1"], params["b1"], params["g1"], params["be1"],
                     gemm_dtype=gemm_dtype)
    y = conv_bn_relu(y, params["w2"], params["b2"], params["g2"], params["be2"],
                     gemm_dtype=gemm_dtype)
    return jnp.transpose(y, (0, 3, 1, 2))    # NHWC -> NCHW


# ---------------- pure-JAX reference (for correctness check) ----------------
def _ref_block(x_nchw, w, b, g, be):
    y = jax.lax.conv_general_dilated(
        x_nchw, w, window_strides=(1, 1), padding=((1, 1), (1, 1)),
        dimension_numbers=("NCHW", "OIHW", "NCHW"))
    y = y + b[None, :, None, None]
    mean = jnp.mean(y, axis=(0, 2, 3), keepdims=True)
    var = jnp.mean((y - mean) ** 2, axis=(0, 2, 3), keepdims=True)
    y = (y - mean) * jax.lax.rsqrt(var + 1e-5) \
        * g[None, :, None, None] + be[None, :, None, None]
    return jnp.maximum(y, 0.0)


def _ref_double_cov(x_nchw, p):
    y = _ref_block(x_nchw, p["w1"], p["b1"], p["g1"], p["be1"])
    return _ref_block(y, p["w2"], p["b2"], p["g2"], p["be2"])


if __name__ == "__main__":
    # Small shapes consistent with DoubleCov(input=4, output=8) on 16x16 images.
    N, Cin, Cout, H, W = 2, 4, 8, 16, 16

    key = jax.random.PRNGKey(0)
    k = jax.random.split(key, 6)
    s1 = 1.0 / (Cin * 9) ** 0.5
    s2 = 1.0 / (Cout * 9) ** 0.5
    params = {
        "w1": jax.random.uniform(k[0], (Cout, Cin, 3, 3), jnp.float32, -s1, s1),
        "b1": jax.random.uniform(k[1], (Cout,), jnp.float32, -s1, s1),
        "g1": jnp.ones((Cout,), jnp.float32),    # BatchNorm gamma init (ones)
        "be1": jnp.zeros((Cout,), jnp.float32),  # BatchNorm beta init (zeros)
        "w2": jax.random.uniform(k[2], (Cout, Cout, 3, 3), jnp.float32, -s2, s2),
        "b2": jax.random.uniform(k[3], (Cout,), jnp.float32, -s2, s2),
        "g2": jnp.ones((Cout,), jnp.float32),
        "be2": jnp.zeros((Cout,), jnp.float32),
    }

    x = jax.random.normal(k[4], (N, Cin, H, W), jnp.float32)
    ref = jax.block_until_ready(_ref_double_cov(x, params))

    # Tight numerical validation with the f32 GEMM path.
    out_f32 = jax.block_until_ready(
        double_cov(x, params, gemm_dtype=jnp.float32))
    assert out_f32.shape == (N, Cout, H, W), out_f32.shape
    assert jnp.allclose(out_f32, ref, atol=1e-4, rtol=1e-4), float(
        jnp.max(jnp.abs(out_f32 - ref)))

    # Performance path: bf16 MXU GEMM (looser tolerance from bf16 rounding).
    out_bf16 = jax.block_until_ready(double_cov(x, params))
    assert out_bf16.shape == (N, Cout, H, W), out_bf16.shape
    assert jnp.allclose(out_bf16, ref, atol=5e-2, rtol=5e-2), float(
        jnp.max(jnp.abs(out_bf16 - ref)))

    print("KERNEL_OK")
</pallas_src>

<mosaic_0001>
module attributes {stable_mosaic.version = 11 : i64} {
  func.func @_conv_stats_kernel(%arg0: i32, %arg1: memref<256x36xf32, #tpu.memory_space<vmem>>, %arg2: memref<36x128xf32, #tpu.memory_space<vmem>>, %arg3: memref<1x128xf32, #tpu.memory_space<vmem>>, %arg4: memref<256x128xf32, #tpu.memory_space<vmem>>, %arg5: memref<2x128xf32, #tpu.memory_space<vmem>>) attributes {dimension_semantics = [#tpu.dimension_semantics<arbitrary>], iteration_bounds = array<i64: 2>, scalar_prefetch = 0 : i64, scratch_operands = 0 : i64, tpu.core_type = #tpu.core_type<tc>, window_params = [{transform_indices = @transform_0, window_bounds = array<i64: 256, 36>}, {pipeline_mode = #tpu.pipeline_mode<synchronous>, transform_indices = @transform_1, window_bounds = array<i64: 36, 128>}, {pipeline_mode = #tpu.pipeline_mode<synchronous>, transform_indices = @transform_2, window_bounds = array<i64: 1, 128>}, {transform_indices = @transform_3, window_bounds = array<i64: 256, 128>}, {pipeline_mode = #tpu.pipeline_mode<synchronous>, transform_indices = @transform_4, window_bounds = array<i64: 2, 128>}]} {
    %c0 = arith.constant 0 : index
    %c0_0 = arith.constant 0 : index
    %0 = vector.load %arg1[%c0, %c0_0] : memref<256x36xf32, #tpu.memory_space<vmem>>, vector<256x36xf32>
    %c0_1 = arith.constant 0 : index
    %c0_2 = arith.constant 0 : index
    %1 = vector.load %arg2[%c0_1, %c0_2] : memref<36x128xf32, #tpu.memory_space<vmem>>, vector<36x128xf32>
    %cst = arith.constant dense<0.000000e+00> : vector<256x128xf32>
    %2 = tpu.matmul %0, %1, %cst {dimension_numbers = #tpu.dot_dimension_numbers<[1], [0], [0], [1], [0, 0, 1, 1], [], []>} : vector<256x36xf32>, vector<36x128xf32>, vector<256x128xf32> -> vector<256x128xf32>
    %c0_3 = arith.constant 0 : index
    %c0_4 = arith.constant 0 : index
    %3 = vector.load %arg3[%c0_3, %c0_4] : memref<1x128xf32, #tpu.memory_space<vmem>>, vector<1x128xf32>
    %4 = vector.broadcast %3 : vector<1x128xf32> to vector<256x128xf32>
    %5 = arith.addf %2, %4 : vector<256x128xf32>
    %c0_5 = arith.constant 0 : index
    %c0_6 = arith.constant 0 : index
    %6 = vector.load %arg4[%c0_5, %c0_6] : memref<256x128xf32, #tpu.memory_space<vmem>>, vector<256x128xf32>
    tpu.vector_store %arg4[%c0_5, %c0_6], %5 {strides = array<i32>} : memref<256x128xf32, #tpu.memory_space<vmem>>, vector<256x128xf32>,
    %c0_i32 = arith.constant 0 : i32
    %7 = arith.cmpi eq, %arg0, %c0_i32 : i32
    %8 = arith.extui %7 : i1 to i32
    %c0_i32_7 = arith.constant 0 : i32
    %9 = arith.cmpi ne, %8, %c0_i32_7 : i32
    scf.if %9 {
      %cst_17 = arith.constant 0.000000e+00 : f32
      %21 = vector.broadcast %cst_17 : f32 to vector<2x128xf32>
      %c0_18 = arith.constant 0 : index
      %c0_19 = arith.constant 0 : index
      %22 = vector.load %arg5[%c0_18, %c0_19] : memref<2x128xf32, #tpu.memory_space<vmem>>, vector<2x128xf32>
      tpu.vector_store %arg5[%c0_18, %c0_19], %21 {strides = array<i32>} : memref<2x128xf32, #tpu.memory_space<vmem>>, vector<2x128xf32>,
    } else {
    }
    %c0_8 = arith.constant 0 : index
    %c0_9 = arith.constant 0 : index
    %10 = vector.load %arg5[%c0_8, %c0_9] : memref<2x128xf32, #tpu.memory_space<vmem>>, vector<1x128xf32>
    %cst_10 = arith.constant dense<0.000000e+00> : vector<128xf32>
    %11 = vector.multi_reduction <add>, %5, %cst_10 [0] : vector<256x128xf32> to vector<128xf32>
    %12 = vector.shape_cast %11 : vector<128xf32> to vector<1x128xf32>
    %13 = arith.addf %10, %12 : vector<1x128xf32>
    %c0_11 = arith.constant 0 : index
    %c0_12 = arith.constant 0 : index
    %14 = vector.load %arg5[%c0_11, %c0_12] : memref<2x128xf32, #tpu.memory_space<vmem>>, vector<1x128xf32>
    tpu.vector_store %arg5[%c0_11, %c0_12], %13 {strides = array<i32>} : memref<2x128xf32, #tpu.memory_space<vmem>>, vector<1x128xf32>,
    %c1 = arith.constant 1 : index
    %c0_13 = arith.constant 0 : index
    %15 = vector.load %arg5[%c1, %c0_13] : memref<2x128xf32, #tpu.memory_space<vmem>>, vector<1x128xf32>
    %16 = arith.mulf %5, %5 : vector<256x128xf32>
    %cst_14 = arith.constant dense<0.000000e+00> : vector<128xf32>
    %17 = vector.multi_reduction <add>, %16, %cst_14 [0] : vector<256x128xf32> to vector<128xf32>
    %18 = vector.shape_cast %17 : vector<128xf32> to vector<1x128xf32>
    %19 = arith.addf %15, %18 : vector<1x128xf32>
    %c1_15 = arith.constant 1 : index
    %c0_16 = arith.constant 0 : index
    %20 = vector.load %arg5[%c1_15, %c0_16] : memref<2x128xf32, #tpu.memory_space<vmem>>, vector<1x128xf32>
    tpu.vector_store %arg5[%c1_15, %c0_16], %19 {strides = array<i32>} : memref<2x128xf32, #tpu.memory_space<vmem>>, vector<1x128xf32>,
    return
  }
  func.func @transform_0(%arg0: i32) -> (i32, i32) {
    %c0_i32 = arith.constant 0 : i32
    %c0_i32_0 = arith.constant 0 : i32
    return %arg0, %c0_i32 : i32, i32
  }
  func.func @transform_1(%arg0: i32) -> (i32, i32) {
    %c0_i32 = arith.constant 0 : i32
    %c0_i32_0 = arith.constant 0 : i32
    %c0_i32_1 = arith.constant 0 : i32
    return %c0_i32, %c0_i32_0 : i32, i32
  }
  func.func @transform_2(%arg0: i32) -> (i32, i32) {
    %c0_i32 = arith.constant 0 : i32
    %c0_i32_0 = arith.constant 0 : i32
    %c0_i32_1 = arith.constant 0 : i32
    return %c0_i32, %c0_i32_0 : i32, i32
  }
  func.func @transform_3(%arg0: i32) -> (i32, i32) {
    %c0_i32 = arith.constant 0 : i32
    %c0_i32_0 = arith.constant 0 : i32
    return %arg0, %c0_i32 : i32, i32
  }
  func.func @transform_4(%arg0: i32) -> (i32, i32) {
    %c0_i32 = arith.constant 0 : i32
    %c0_i32_0 = arith.constant 0 : i32
    %c0_i32_1 = arith.constant 0 : i32
    return %c0_i32, %c0_i32_0 : i32, i32
  }
}

</mosaic_0001>

<bundles_post_ra>
// kernel: tpu_custom_call.1
= control target key start
LH: loop header
LB: loop body
LE: loop exit
PB: predicated region body
PF: predicated region fallthrough
CT: control target
= control target key end

     0   :  { %10 = vsyncpa [#allocation3], 0  ;;  %s1627_s0 = inlined_call_operand.vmem [shape: f32[512,36], index: 0, kind: input, shape index: {}]   ;;  %s1628_s1 = inlined_call_operand.vmem [shape: f32[36,128], index: 1, kind: input, shape index: {}]   ;;  %s1629_s2 = inlined_call_operand.vmem [shape: f32[1,128], index: 2, kind: input, shape index: {}]   ;;  %s1630_s3 = inlined_call_operand.hbm [shape: f32[512,128], index: 3, kind: output, shape index: {0}]   ;;  %s1631_s4 = inlined_call_operand.hbm [shape: f32[2,128], index: 4, kind: output, shape index: {1}]  }
   0x1   :  { %12 = vsyncpa [#allocation3 + $0x1], 0 }
   0x2   :  { %13 = vsyncpa [#allocation5], 0  ;;  %s1147_s15 = smov 0   ;;  %s1149_s16 = smov 0  }
   0x3   :  { %s1151_s17 = smov 0   ;;  %s1153_s18 = smov 0  }
   0x4 LB: > { %s1168_s19 = sadd.s32 4294967295, %s1115_s18   ;;  %s815_s20 = sadd.s32 4294967294, %s1115_s18   ;;  %s1115_s18 = sphi %s1153_s18, %s1637_s18   ;;  %s1111_s17 = sphi %s1151_s17, %s1636_s17   ;;  %s1107_s16 = sphi %s1149_s16, %s1635_s16   ;;  %s1103_s15 = sphi %s1147_s15, %s1634_s15  }
   0x5   : > { %s1172_s21 = sadd.s32 1, %s1115_s18   ;;  %s94_s22 = sadd.s32 1, %s1111_s17 }
   0x6   : > { %s91_s23 = ssub.s32 %s1115_s18, %s1172_s21  ;;  %p104_p0 = scmp.ne.s32.totalorder %s1111_s17, %s1107_s16 }
   0x7   : > { %p92_p1 = scmp.eq.s32.totalorder %s91_s23, 0  ;;  %p105_p2 = scmp.eq.s32.totalorder %s1168_s19, 1 }
   0x8   : > { %p110_p3 = scmp.ne.s32.totalorder %s1107_s16, %s1103_s15  ;;  %p111_p4 = scmp.eq.s32.totalorder %s815_s20, 1 }
   0x9   : > { %s1183_s24 = scalar_select %p92_p1, %s1111_s17, %s94_s22  }
   0xa   : > { %p1187_p5 = por %p105_p2, %p104_p0  ;;  %p1191_p6 = por %p111_p4, %p110_p3 }
   0xb   : > { %p818_p7 = scmp.ge.s32.totalorder %s1115_s18, 1  ;;  %p165_p8 = scmp.lt.s32.totalorder %s1115_s18, 3 }
   0xd   : > { %p166_p9 = pnand %p818_p7, %p165_p8 }
   0xe   : > { %v230_v0 = vld [vmem:[%s1628_s1] sm:$0xff] (!%p166_p9)  ;;  %v231_v1 = vld [vmem:[%s1628_s1 + $0x8] sm:$0xff] (!%p166_p9)  ;;  %v232_v2 = vld [vmem:[%s1628_s1 + $0x10] sm:$0xff] (!%p166_p9)  ;;  %s820_s7 = sshll.u32 (!%p166_p9), %s1168_s19, 5  ;;  %vm339_vm0 = vcmask (!%p166_p9), 1043456   ;;  %vm242_vm1 = vcmask (!%p166_p9), 293888  }
   0xf   : > { %169 = sbr.rel (%p166_p9) target bundleno = 388 (0x184), region = 32  ;;  %v960_v3 = vpack.c.bf16 (!%p166_p9), %v231_v1, %v230_v0  ;;  %v233_v4 = vld [vmem:[%s1628_s1 + $0x18] sm:$0xff] (!%p166_p9)  ;;  %p192_p10 = scmp.lt.s32.totalorder (!%p166_p9), %s820_s7, 63  ;;  %v234_v6 = vld [vmem:[%s1628_s1 + $0x20] sm:$0xf] (!%p166_p9) }
  0x10   : > { %v964_v5 = vpack.c.bf16 (!%p166_p9), %v233_v4, %v232_v2  ;;  %s186_s22 = sand.u32 (!%p166_p9), 1, %s1107_s16   ;;  %v1292_v39 = vld [vmem:[%s1629_s2] ss:$0 sm:$0xff] (!%p166_p9)  ;;  %p856_p11 = scmp.ne.s32.totalorder (!%p166_p9), %s1168_s19, 0 }
  0x11   : > { %961 = vmatprep.subr.bf16.mxu0 (!%p166_p9), %v960_v3  ;;  %968 = vmatprep.subr.bf16.mxu1 (!%p166_p9), %v960_v3  ;;  %s819_s23 = sshll.u32 (!%p166_p9), %s186_s22, 8 }
  0x12   : > { %963 = vmatpush3.bf16.msra.mxu0 (!%p166_p9), %v960_v3  ;;  %971 = vmatpush3.bf16.msra.mxu1 (!%p166_p9), %v960_v3  ;;  %s1306_s29 = scalar_lea.vmem (!%p166_p9), [#allocation2], %s819_s23 }
  0x13   : > { %965 = vmatprep.subr.bf16.mxu0 (!%p166_p9), %v964_v5  ;;  %969 = vmatprep.subr.bf16.mxu1 (!%p166_p9), %v964_v5 }
  0x16   : > { %s1639_s7 = smov (!%p192_p10, %s820_s7), 63  ;;  %967 = vmatpush3.bf16.msra.mxu0 %v964_v5  ;;  %972 = vmatpush3.bf16.msra.mxu1 %v964_v5 }
  0x17   : > { %s821_s10 = sshll.u32 %s1639_s7, 3  ;;  %910 = vmatprep.subr.msk.mxu0 %vm339_vm0, %v234_v6  ;;  %970 = vmatprep.subr.msk.mxu1 %vm339_vm0, %v234_v6 }
  0x18   : > { %s1216_s20 = scalar_lea.vmem %s1627_s0, %s821_s10 }
  0x19   : > { %v198_v7 = vld [vmem:[%s1216_s20] sm:$0xff]  ;;  %v199_v9 = vld [vmem:[%s1216_s20 + $0x8] sm:$0xff]  ;;  %v200_v11 = vld [vmem:[%s1216_s20 + $0x10] sm:$0xff] }
  0x1a   : > { %v214_v8 = vld [vmem:[%s1216_s20 + $0x80] sm:$0xff]  ;;  %912 = vmatprep.mubr.msk.f32.mxu0 %vm242_vm1, %v198_v7  ;;  %v215_v10 = vld [vmem:[%s1216_s20 + $0x88] sm:$0xff]  ;;  %v216_v12 = vld [vmem:[%s1216_s20 + $0x90] sm:$0xff]  ;;  %911 = vmatpush3.msk.msra.mxu0 %vm339_vm0, %v234_v6 }
  0x1b   : > { %936 = vmatprep.mubr.msk.f32.mxu1 %vm242_vm1, %v214_v8  ;;  %973 = vmatpush3.msk.msra.mxu1 %vm339_vm0, %v234_v6  ;;  %v201_v13 = vld [vmem:[%s1216_s20 + $0x18] sm:$0xff]  ;;  %v202_v15 = vld [vmem:[%s1216_s20 + $0x20] sm:$0xff]  ;;  %v203_v17 = vld [vmem:[%s1216_s20 + $0x28] sm:$0xff] }
  0x1c   : > { %913 = vmatmul.mubr.msk.f32.vlgmr.msra.gmra.mrb[0].mxu0 %vm242_vm1, %v199_v9  ;;  %937 = vmatmul.mubr.msk.f32.vlgmr.msra.gmra.mrb[0].mxu1 %vm242_vm1, %v215_v10  ;;  %v217_v14 = vld [vmem:[%s1216_s20 + $0x98] sm:$0xff]  ;;  %v218_v16 = vld [vmem:[%s1216_s20 + $0xa0] sm:$0xff]  ;;  %v219_v18 = vld [vmem:[%s1216_s20 + $0xa8] sm:$0xff] }
  0x1d   : > { %915 = vmatprep.mubr.msk.f32.mxu0 %vm242_vm1, %v200_v11  ;;  %939 = vmatprep.mubr.msk.f32.mxu1 %vm242_vm1, %v216_v12  ;;  %v204_v19 = vld [vmem:[%s1216_s20 + $0x30] sm:$0xff]  ;;  %v205_v21 = vld [vmem:[%s1216_s20 + $0x38] sm:$0xff]  ;;  %v206_v23 = vld [vmem:[%s1216_s20 + $0x40] sm:$0xff] }
  0x1e   : > { %v220_v20 = vld [vmem:[%s1216_s20 + $0xb0] sm:$0xff]  ;;  %v221_v22 = vld [vmem:[%s1216_s20 + $0xb8] sm:$0xff]  ;;  %v222_v24 = vld [vmem:[%s1216_s20 + $0xc0] sm:$0xff] }
  0x1f   : > { %v207_v25 = vld [vmem:[%s1216_s20 + $0x48] sm:$0xff]  ;;  %v208_v27 = vld [vmem:[%s1216_s20 + $0x50] sm:$0xff]  ;;  %v209_v29 = vld [vmem:[%s1216_s20 + $0x58] sm:$0xff] }
  0x20   : > { %916 = vmatmul.mubr.msk.f32.gmra.mrb[2].mxu0 %vm242_vm1, %v201_v13  ;;  %940 = vmatmul.mubr.msk.f32.gmra.mrb[2].mxu1 %vm242_vm1, %v217_v14  ;;  %v223_v26 = vld [vmem:[%s1216_s20 + $0xc8] sm:$0xff]  ;;  %v224_v28 = vld [vmem:[%s1216_s20 + $0xd0] sm:$0xff]  ;;  %v225_v30 = vld [vmem:[%s1216_s20 + $0xd8] sm:$0xff] }
  0x21   : > { %918 = vmatprep.mubr.msk.f32.mxu0 %vm242_vm1, %v202_v15  ;;  %942 = vmatprep.mubr.msk.f32.mxu1 %vm242_vm1, %v218_v16  ;;  %v210_v31 = vld [vmem:[%s1216_s20 + $0x60] sm:$0xff]  ;;  %v211_v33 = vld [vmem:[%s1216_s20 + $0x68] sm:$0xff]  ;;  %v212_v35 = vld [vmem:[%s1216_s20 + $0x70] sm:$0xff] }
  0x22   : > { %v226_v32 = vld [vmem:[%s1216_s20 + $0xe0] sm:$0xff]  ;;  %v227_v34 = vld [vmem:[%s1216_s20 + $0xe8] sm:$0xff]  ;;  %v228_v36 = vld [vmem:[%s1216_s20 + $0xf0] sm:$0xff] }
  0x23   : > { %v213_v37 = vld [vmem:[%s1216_s20 + $0x78] sm:$0xff] }
  0x24   : > { %919 = vmatmul.mubr.msk.f32.gmra.mrb[4].mxu0 %vm242_vm1, %v203_v17  ;;  %943 = vmatmul.mubr.msk.f32.gmra.mrb[4].mxu1 %vm242_vm1, %v219_v18  ;;  %v229_v38 = vld [vmem:[%s1216_s20 + $0xf8] sm:$0xff] }
  0x25   : > { %921 = vmatprep.mubr.msk.f32.mxu0 %vm242_vm1, %v204_v19  ;;  %945 = vmatprep.mubr.msk.f32.mxu1 %vm242_vm1, %v220_v20 }
  0x28   : > { %922 = vmatmul.mubr.msk.f32.gmra.mrb[6].mxu0 %vm242_vm1, %v205_v21  ;;  %946 = vmatmul.mubr.msk.f32.gmra.mrb[6].mxu1 %vm242_vm1, %v221_v22 }
  0x29   : > { %924 = vmatprep.mubr.msk.f32.mxu0 %vm242_vm1, %v206_v23  ;;  %948 = vmatprep.mubr.msk.f32.mxu1 %vm242_vm1, %v222_v24 }
  0x2c   : > { %925 = vmatmul.mubr.msk.f32.gmra.mrb[8].mxu0 %vm242_vm1, %v207_v25  ;;  %949 = vmatmul.mubr.msk.f32.gmra.mrb[8].mxu1 %vm242_vm1, %v223_v26 }
  0x2d   : > { %927 = vmatprep.mubr.msk.f32.mxu0 %vm242_vm1, %v208_v27  ;;  %951 = vmatprep.mubr.msk.f32.mxu1 %vm242_vm1, %v224_v28 }
  0x30   : > { %928 = vmatmul.mubr.msk.f32.gmra.mrb[10].mxu0 %vm242_vm1, %v209_v29  ;;  %952 = vmatmul.mubr.msk.f32.gmra.mrb[10].mxu1 %vm242_vm1, %v225_v30 }
  0x31   : > { %930 = vmatprep.mubr.msk.f32.mxu0 %vm242_vm1, %v210_v31  ;;  %954 = vmatprep.mubr.msk.f32.mxu1 %vm242_vm1, %v226_v32 }
  0x34   : > { %931 = vmatmul.mubr.msk.f32.gmra.mrb[12].mxu0 %vm242_vm1, %v211_v33  ;;  %955 = vmatmul.mubr.msk.f32.gmra.mrb[12].mxu1 %vm242_vm1, %v227_v34 }
  0x35   : > { %933 = vmatprep.mubr.msk.f32.mxu0 %vm242_vm1, %v212_v35  ;;  %957 = vmatprep.mubr.msk.f32.mxu1 %vm242_vm1, %v228_v36 }
  0x38   : > { %934 = vmatmul.mubr.msk.f32.gmra.mrb[14].mxu0 %vm242_vm1, %v213_v37  ;;  %958 = vmatmul.mubr.msk.f32.gmra.mrb[14].mxu1 %vm242_vm1, %v229_v38 }
  0xef   : > { %v914_v40 = vpop.f32.mrb[0].mxu0  ;;  %v938_v41 = vpop.f32.mrb[0].mxu1 }
  0xf0   : > { %v1295_v42 = vadd.f32 %v914_v40, %v1292_v39  ;;  %v1298_v43 = vadd.f32 %v938_v41, %v1292_v39  ;;  %v409_v44 = vpop.f32.mrb[1].mxu0  ;;  %v489_v45 = vpop.f32.mrb[1].mxu1  ;;  %v1117_v41 = vmov (!%p856_p11), 0.0  }
  0xf1   : > { %v1301_v46 = vadd.f32 %v1292_v39, %v409_v44  ;;  %v1304_v47 = vadd.f32 %v1292_v39, %v489_v45  ;;  %604 = vst [vmem:[#allocation4] sm:$0x3] (!%p856_p11), %v1117_v41 }
  0xf2   : > { %569 = vst [vmem:[%s1306_s29 + $0x8] sm:$0xff] %v1295_v42  ;;  %585 = vst [vmem:[%s1306_s29 + $0x88] sm:$0xff] %v1298_v43 }
  0xf3   : > { %568 = vst [vmem:[%s1306_s29] sm:$0xff] %v1301_v46  ;;  %584 = vst [vmem:[%s1306_s29 + $0x80] sm:$0xff] %v1304_v47  ;;  %v917_v48 = vpop.f32.mrb[2].mxu0  ;;  %v941_v49 = vpop.f32.mrb[2].mxu1 }
  0xf4   : > { %v1317_v50 = vadd.f32 %v917_v48, %v1292_v39  ;;  %v1320_v51 = vadd.f32 %v941_v49, %v1292_v39  ;;  %v419_v52 = vpop.f32.mrb[3].mxu0  ;;  %v499_v53 = vpop.f32.mrb[3].mxu1 }
  0xf5   : > { %v1323_v54 = vadd.f32 %v1292_v39, %v419_v52  ;;  %v1326_v55 = vadd.f32 %v1292_v39, %v499_v53 }
  0xf6   : > { %571 = vst [vmem:[%s1306_s29 + $0x18] sm:$0xff] %v1317_v50  ;;  %587 = vst [vmem:[%s1306_s29 + $0x98] sm:$0xff] %v1320_v51 }
  0xf7   : > { %570 = vst [vmem:[%s1306_s29 + $0x10] sm:$0xff] %v1323_v54  ;;  %586 = vst [vmem:[%s1306_s29 + $0x90] sm:$0xff] %v1326_v55  ;;  %v920_v56 = vpop.f32.mrb[4].mxu0  ;;  %v944_v57 = vpop.f32.mrb[4].mxu1 }
  0xf8   : > { %v1337_v58 = vadd.f32 %v920_v56, %v1292_v39  ;;  %v1340_v59 = vadd.f32 %v944_v57, %v1292_v39  ;;  %v429_v60 = vpop.f32.mrb[5].mxu0  ;;  %v509_v61 = vpop.f32.mrb[5].mxu1 }
  0xf9   : > { %v1343_v62 = vadd.f32 %v1292_v39, %v429_v60  ;;  %v1346_v63 = vadd.f32 %v1292_v39, %v509_v61 }
  0xfa   : > { %573 = vst [vmem:[%s1306_s29 + $0x28] sm:$0xff] %v1337_v58  ;;  %589 = vst [vmem:[%s1306_s29 + $0xa8] sm:$0xff] %v1340_v59 }
  0xfb   : > { %572 = vst [vmem:[%s1306_s29 + $0x20] sm:$0xff] %v1343_v62  ;;  %588 = vst [vmem:[%s1306_s29 + $0xa0] sm:$0xff] %v1346_v63  ;;  %v923_v0 = vpop.f32.mrb[6].mxu0  ;;  %v947_v1 = vpop.f32.mrb[6].mxu1 }
  0xfc   : > { %v1357_v2 = vadd.f32 %v923_v0, %v1292_v39  ;;  %v1360_v3 = vadd.f32 %v947_v1, %v1292_v39  ;;  %v439_v4 = vpop.f32.mrb[7].mxu0  ;;  %v519_v5 = vpop.f32.mrb[7].mxu1 }
  0xfd   : > { %v1363_v6 = vadd.f32 %v1292_v39, %v439_v4  ;;  %v1366_v7 = vadd.f32 %v1292_v39, %v519_v5 }
  0xfe   : > { %575 = vst [vmem:[%s1306_s29 + $0x38] sm:$0xff] %v1357_v2  ;;  %591 = vst [vmem:[%s1306_s29 + $0xb8] sm:$0xff] %v1360_v3 }
  0xff   : > { %574 = vst [vmem:[%s1306_s29 + $0x30] sm:$0xff] %v1363_v6  ;;  %590 = vst [vmem:[%s1306_s29 + $0xb0] sm:$0xff] %v1366_v7  ;;  %v926_v8 = vpop.f32.mrb[8].mxu0  ;;  %v950_v9 = vpop.f32.mrb[8].mxu1 }
 0x100   : > { %v1377_v10 = vadd.f32 %v926_v8, %v1292_v39  ;;  %v1380_v11 = vadd.f32 %v950_v9, %v1292_v39  ;;  %v449_v12 = vpop.f32.mrb[9].mxu0  ;;  %v529_v13 = vpop.f32.mrb[9].mxu1 }
 0x101   : > { %v1383_v14 = vadd.f32 %v1292_v39, %v449_v12  ;;  %v1386_v15 = vadd.f32 %v1292_v39, %v529_v13 }
 0x102   : > { %577 = vst [vmem:[%s1306_s29 + $0x48] sm:$0xff] %v1377_v10  ;;  %593 = vst [vmem:[%s1306_s29 + $0xc8] sm:$0xff] %v1380_v11 }
 0x103   : > { %576 = vst [vmem:[%s1306_s29 + $0x40] sm:$0xff] %v1383_v14  ;;  %592 = vst [vmem:[%s1306_s29 + $0xc0] sm:$0xff] %v1386_v15  ;;  %v929_v16 = vpop.f32.mrb[10].mxu0  ;;  %v953_v17 = vpop.f32.mrb[10].mxu1 }
 0x104   : > { %v1397_v18 = vadd.f32 %v929_v16, %v1292_v39  ;;  %v1400_v19 = vadd.f32 %v953_v17, %v1292_v39  ;;  %v459_v20 = vpop.f32.mrb[11].mxu0  ;;  %v539_v21 = vpop.f32.mrb[11].mxu1 }
 0x105   : > { %v1403_v22 = vadd.f32 %v1292_v39, %v459_v20  ;;  %v1406_v23 = vadd.f32 %v1292_v39, %v539_v21 }
 0x106   : > { %579 = vst [vmem:[%s1306_s29 + $0x58] sm:$0xff] %v1397_v18  ;;  %595 = vst [vmem:[%s1306_s29 + $0xd8] sm:$0xff] %v1400_v19 }
 0x107   : > { %578 = vst [vmem:[%s1306_s29 + $0x50] sm:$0xff] %v1403_v22  ;;  %594 = vst [vmem:[%s1306_s29 + $0xd0] sm:$0xff] %v1406_v23  ;;  %v932_v24 = vpop.f32.mrb[12].mxu0  ;;  %v956_v25 = vpop.f32.mrb[12].mxu1 }
 0x108   : > { %v1417_v26 = vadd.f32 %v932_v24, %v1292_v39  ;;  %v1420_v27 = vadd.f32 %v956_v25, %v1292_v39  ;;  %v469_v28 = vpop.f32.mrb[13].mxu0  ;;  %v549_v29 = vpop.f32.mrb[13].mxu1 }
 0x109   : > { %v1423_v30 = vadd.f32 %v1292_v39, %v469_v28  ;;  %v1426_v31 = vadd.f32 %v1292_v39, %v549_v29  ;;  %603 = sbr.rel (%p856_p11) target bundleno = 272 (0x110), region = 36 }
 0x10a   : > { %581 = vst [vmem:[%s1306_s29 + $0x68] sm:$0xff] %v1417_v26  ;;  %597 = vst [vmem:[%s1306_s29 + $0xe8] sm:$0xff] %v1420_v27 }
 0x10b   : > { %580 = vst [vmem:[%s1306_s29 + $0x60] sm:$0xff] %v1423_v30  ;;  %596 = vst [vmem:[%s1306_s29 + $0xe0] sm:$0xff] %v1426_v31  ;;  %v935_v32 = vpop.f32.mrb[14].mxu0  ;;  %v959_v33 = vpop.f32.mrb[14].mxu1 }
 0x10c   : > { %v1437_v34 = vadd.f32 %v935_v32, %v1292_v39  ;;  %v1440_v35 = vadd.f32 %v959_v33, %v1292_v39  ;;  %v479_v36 = vpop.f32.mrb[15].mxu0  ;;  %v559_v37 = vpop.f32.mrb[15].mxu1 }
 0x10d   : > { %v1443_v38 = vadd.f32 %v1292_v39, %v479_v36  ;;  %v1446_v40 = vadd.f32 %v1292_v39, %v559_v37 }
 0x10e   : > { %583 = vst [vmem:[%s1306_s29 + $0x78] sm:$0xff] %v1437_v34  ;;  %599 = vst [vmem:[%s1306_s29 + $0xf8] sm:$0xff] %v1440_v35 }
 0x10f   : > { %582 = vst [vmem:[%s1306_s29 + $0x70] sm:$0xff] %v1443_v38  ;;  %598 = vst [vmem:[%s1306_s29 + $0xf0] sm:$0xff] %v1446_v40 }
 0x110 PF: > { %v606_v39 = vadd.f32 %v1295_v42, %v1301_v46  ;;  %s864_s30 = sshll.u32 %s1168_s19, 12  ;;  %s731_s8 = sshll.u32 %s1306_s29, 4  ;;  %s1467_s8 = int_to_ptr.vmem [resolvable:$true] %s731_s8 }
 0x111   : > { %s1463_s7 = scalar_lea.hbm %s1630_s3, %s864_s30  ;;  %s1472_s9 = scalar_lea.sflag [#allocation3], %s186_s22 }
 0x112   : > { %v607_v44 = vadd.f32 %v606_v39, %v1323_v54  ;;  %s1023_s10 = scalar_lea.vmem %s1467_s8, 4096  ;;  %s1118_s11 = smov [#allocation2]  }
 0x113   : > { %p1024_p12 = scmp.ne.s32.totalorder %s1467_s8, %s1023_s10  ;;  %s1027_s12 = sshll.u32 %s1118_s11, 4  ;;  %s1028_s12 = int_to_ptr.vmem [resolvable:$false] %s1027_s12 }
 0x114   : > { %v608_v45 = vadd.f32 %v607_v44, %v1317_v50  ;;  %s1029_s13 = scalar_lea.vmem %s1028_s12, 8192  ;;  %p1030_p1 = scmp.lt.s32.totalorder %s1467_s8, %s1028_s12 }
 0x115   : > { %p1025_p13 = pnand %p1024_p12, %p1187_p5  ;;  %p1031_p3 = scmp.lt.s32.totalorder %s1029_s13, %s1023_s10 }
 0x117   : > { %p1026_p0 = pneg %p1025_p13  ;;  %p1032_p4 = por %p1031_p3, %p1030_p1 }
 0x119   : > { %p1033_p7 = pnand %p1032_p4, %p1026_p0 }
 0x11b   : > { %1036 = shalt.err (!%p1033_p7)
}
 0x11c   : > { %s1037_s14 = scalar_lea.hbm %s1463_s7, 4096  ;;  %s1041_s23 = scalar_lea.hbm %s1630_s3, 8192 }
 0x11d   : > { %p1038_p8 = scmp.ne.s32.totalorder %s1463_s7, %s1037_s14  ;;  %p1042_p11 = scmp.lt.u32.totalorder %s1463_s7, %s1630_s3 }
 0x11e   : > { %p1043_p12 = scmp.lt.u32.totalorder %s1041_s23, %s1037_s14  ;;  %p1045_p0 = scmp.lt.u32.totalorder %s1037_s14, %s1463_s7 }
 0x11f   : > { %p1039_p9 = pnand %p1038_p8, %p1187_p5 }
 0x120   : > { %p1044_p13 = por %p1043_p12, %p1042_p11 }
 0x121   : > { %p1040_p10 = pneg %p1039_p9 }
 0x122   : > { %p1046_p1 = por %p1045_p0, %p1044_p13 }
 0x124   : > { %p1047_p3 = pnand %p1046_p1, %p1040_p10 }
 0x126   : > { %1050 = shalt.err (!%p1047_p3)
}
 0x127   : > { %s1119_s29 = smov 128   ;;  %s1120_s30 = smov 8   ;;  %v646_v48 = vmul.f32 %v1301_v46, %v1301_v46  ;;  %v647_v49 = vmul.f32 %v1295_v42, %v1295_v42  ;;  %v609_v52 = vadd.f32 %v608_v45, %v1343_v62  ;;  %v648_v53 = vmul.f32 %v1323_v54, %v1323_v54 }
 0x128   : > { %974 = dma.vmem_to_hbm [thread:$0]  (%p1187_p5), %s1467_s8, 4096, %s1463_s7, %s1472_s9, %s1119_s29, %s1119_s29, %s1120_s30   ;;  %v649_v57 = vmul.f32 %v1317_v50, %v1317_v50  ;;  %v650_v0 = vmul.f32 %v1343_v62, %v1343_v62  ;;  %v651_v42 = vmul.f32 %v1337_v58, %v1337_v58  ;;  %v652_v5 = vmul.f32 %v1363_v6, %v1363_v6 }
 0x129   : > { %v610_v56 = vadd.f32 %v609_v52, %v1337_v58  ;;  %v678_v60 = vadd.f32 %v647_v49, %v646_v48  ;;  %v653_v9 = vmul.f32 %v1357_v2, %v1357_v2  ;;  %v654_v13 = vmul.f32 %v1383_v14, %v1383_v14  ;;  %s1121_s25 = smov [#allocation4]  }
 0x12a   : > { %v655_v17 = vmul.f32 %v1377_v10, %v1377_v10  ;;  %v656_v21 = vmul.f32 %v1403_v22, %v1403_v22  ;;  %v657_v25 = vmul.f32 %v1397_v18, %v1397_v18  ;;  %v658_v29 = vmul.f32 %v1423_v30, %v1423_v30  ;;  %s745_s5 = sshll.u32 %s1121_s25, 4  ;;  %s746_s5 = int_to_ptr.vmem [resolvable:$true] %s745_s5 }
 0x12b   : > { %v611_v61 = vadd.f32 %v610_v56, %v1363_v6  ;;  %v679_v46 = vadd.f32 %v678_v60, %v648_v53  ;;  %v659_v33 = vmul.f32 %v1417_v26, %v1417_v26  ;;  %v660_v37 = vmul.f32 %v1443_v38, %v1443_v38  ;;  %s1051_s6 = scalar_lea.vmem %s746_s5, 32  ;;  %p1058_p8 = scmp.lt.s32.totalorder %s746_s5, %s746_s5 }
 0x12c   : > { %v661_v39 = vmul.f32 %v1437_v34, %v1437_v34  ;;  %v662_v45 = vmul.f32 %v1304_v47, %v1304_v47  ;;  %v663_v49 = vmul.f32 %v1298_v43, %v1298_v43  ;;  %v664_v53 = vmul.f32 %v1326_v55, %v1326_v55  ;;  %p1052_p5 = scmp.ne.s32.totalorder %s746_s5, %s1051_s6  ;;  %p1059_p9 = scmp.lt.s32.totalorder %s1051_s6, %s1051_s6 }
 0x12d   : > { %v612_v1 = vadd.f32 %v611_v61, %v1357_v2  ;;  %v680_v4 = vadd.f32 %v679_v46, %v649_v57  ;;  %v665_v57 = vmul.f32 %v1320_v51, %v1320_v51  ;;  %v666_v61 = vmul.f32 %v1346_v63, %v1346_v63 }
 0x12e   : > { %v667_v46 = vmul.f32 %v1340_v59, %v1340_v59  ;;  %p1053_p4 = pnand %p1052_p5, %p105_p2  ;;  %p1060_p10 = por %p1059_p9, %p1058_p8 }
 0x12f   : > { %v613_v54 = vadd.f32 %v612_v1, %v1383_v14  ;;  %v681_v8 = vadd.f32 %v680_v4, %v650_v0 }
 0x130   : > { %p1054_p7 = pneg %p1053_p4 }
 0x131   : > { %v614_v50 = vadd.f32 %v613_v54, %v1377_v10  ;;  %v682_v12 = vadd.f32 %v681_v8, %v651_v42  ;;  %v668_v42 = vmul.f32 %v1366_v7, %v1366_v7  ;;  %v669_v54 = vmul.f32 %v1360_v3, %v1360_v3 }
 0x132   : > { %v670_v8 = vmul.f32 %v1386_v15, %v1386_v15  ;;  %p1061_p11 = pnand %p1060_p10, %p1054_p7 }
 0x133   : > { %v615_v62 = vadd.f32 %v614_v50, %v1403_v22  ;;  %v683_v16 = vadd.f32 %v682_v12, %v652_v5 }
 0x135   : > { %v616_v58 = vadd.f32 %v615_v62, %v1397_v18  ;;  %v684_v20 = vadd.f32 %v683_v16, %v653_v9  ;;  %v671_v9 = vmul.f32 %v1380_v11, %v1380_v11  ;;  %v672_v62 = vmul.f32 %v1406_v23, %v1406_v23 }
 0x136   : > { %v673_v16 = vmul.f32 %v1400_v19, %v1400_v19 }
 0x137   : > { %v617_v6 = vadd.f32 %v616_v58, %v1423_v30  ;;  %v685_v24 = vadd.f32 %v684_v20, %v654_v13 }
 0x139   : > { %v618_v2 = vadd.f32 %v617_v6, %v1417_v26  ;;  %v686_v28 = vadd.f32 %v685_v24, %v655_v17  ;;  %v674_v17 = vmul.f32 %v1426_v31, %v1426_v31  ;;  %v675_v6 = vmul.f32 %v1420_v27, %v1420_v27 }
 0x13a   : > { %v676_v24 = vmul.f32 %v1446_v40, %v1446_v40 }
 0x13b   : > { %v619_v14 = vadd.f32 %v618_v2, %v1443_v38  ;;  %v687_v32 = vadd.f32 %v686_v28, %v656_v21 }
 0x13d   : > { %v620_v10 = vadd.f32 %v619_v14, %v1437_v34  ;;  %v688_v36 = vadd.f32 %v687_v32, %v657_v25 }
 0x13f   : > { %v621_v22 = vadd.f32 %v620_v10, %v1304_v47  ;;  %v689_v41 = vadd.f32 %v688_v36, %v658_v29 }
 0x141   : > { %v622_v18 = vadd.f32 %v621_v22, %v1298_v43  ;;  %v690_v44 = vadd.f32 %v689_v41, %v659_v33  ;;  %v605_v33 = vld [vmem:[#allocation4] sm:$0x1] }
 0x143   : > { %v623_v30 = vadd.f32 %v622_v18, %v1326_v55  ;;  %v691_v48 = vadd.f32 %v690_v44, %v660_v37 }
 0x145   : > { %v624_v26 = vadd.f32 %v623_v30, %v1320_v51  ;;  %v692_v52 = vadd.f32 %v691_v48, %v661_v39  ;;  %v645_v39 = vld [vmem:[#allocation4 + $0x1] sm:$0x1] }
 0x147   : > { %v625_v38 = vadd.f32 %v624_v26, %v1346_v63  ;;  %v693_v56 = vadd.f32 %v692_v52, %v662_v45 }
 0x149   : > { %v626_v34 = vadd.f32 %v625_v38, %v1340_v59  ;;  %v694_v60 = vadd.f32 %v693_v56, %v663_v49 }
 0x14b   : > { %v627_v47 = vadd.f32 %v626_v34, %v1366_v7  ;;  %v695_v0 = vadd.f32 %v694_v60, %v664_v53 }
 0x14d   : > { %v628_v43 = vadd.f32 %v627_v47, %v1360_v3  ;;  %v696_v1 = vadd.f32 %v695_v0, %v665_v57 }
 0x14f   : > { %v629_v55 = vadd.f32 %v628_v43, %v1386_v15  ;;  %v697_v4 = vadd.f32 %v696_v1, %v666_v61 }
 0x151   : > { %v630_v51 = vadd.f32 %v629_v55, %v1380_v11  ;;  %v698_v5 = vadd.f32 %v697_v4, %v667_v46 }
 0x153   : > { %v631_v63 = vadd.f32 %v630_v51, %v1406_v23  ;;  %v699_v50 = vadd.f32 %v698_v5, %v668_v42 }
 0x155   : > { %v632_v59 = vadd.f32 %v631_v63, %v1400_v19  ;;  %v700_v12 = vadd.f32 %v699_v50, %v669_v54  ;;  %v677_v19 = vmul.f32 %v1440_v35, %v1440_v35 }
 0x157   : > { %v633_v7 = vadd.f32 %v632_v59, %v1426_v31  ;;  %v701_v13 = vadd.f32 %v700_v12, %v670_v8 }
 0x159   : > { %v634_v3 = vadd.f32 %v633_v7, %v1420_v27  ;;  %v702_v58 = vadd.f32 %v701_v13, %v671_v9 }
 0x15b   : > { %v635_v15 = vadd.f32 %v634_v3, %v1446_v40  ;;  %v703_v20 = vadd.f32 %v702_v58, %v672_v62 }
 0x15d   : > { %v636_v11 = vadd.f32 %v635_v15, %v1440_v35  ;;  %v704_v21 = vadd.f32 %v703_v20, %v673_v16 }
 0x15f   : > { %v637_v23 = vrot.slane %v636_v11, 4  ;;  %v705_v2 = vadd.f32 %v704_v21, %v674_v17 }
 0x161   : > { %v638_v25 = vadd.f32 %v637_v23, %v636_v11  ;;  %v706_v28 = vadd.f32 %v705_v2, %v675_v6 }
 0x163   : > { %v639_v14 = vrot.slane %v638_v25, 2  ;;  %v707_v29 = vadd.f32 %v706_v28, %v676_v24 }
 0x165   : > { %v640_v31 = vadd.f32 %v639_v14, %v638_v25  ;;  %v708_v32 = vadd.f32 %v707_v29, %v677_v19 }
 0x167   : > { %v641_v10 = vrot.slane %v640_v31, 1  ;;  %v709_v36 = vrot.slane %v708_v32, 4 }
 0x169   : > { %v642_v22 = vadd.f32 %v641_v10, %v640_v31  ;;  %v710_v27 = vadd.f32 %v709_v36, %v708_v32 }
 0x16b   : > { %v643_v37 = vadd.f32 %v642_v22, %v605_v33  ;;  %v711_v41 = vrot.slane %v710_v27, 2 }
 0x16d   : > { %644 = vst [vmem:[#allocation4] sm:$0x1] %v643_v37  ;;  %v712_v40 = vadd.f32 %v711_v41, %v710_v27 }
 0x16f   : > { %v713_v18 = vrot.slane %v712_v40, 1 }
 0x171   : > { %v714_v35 = vadd.f32 %v713_v18, %v712_v40 }
 0x173   : > { %v715_v44 = vadd.f32 %v714_v35, %v645_v39 }
 0x175   : > { %716 = vst [vmem:[#allocation4 + $0x1] sm:$0x1] %v715_v44 }
 0x176   : > { %1064 = shalt.err (!%p1061_p11)
}
 0x177   : > { %s1065_s9 = scalar_lea.hbm %s1631_s4, 32 }
 0x178   : > { %p1066_p12 = scmp.ne.s32.totalorder %s1631_s4, %s1065_s9  ;;  %p1071_p1 = scmp.lt.u32.totalorder %s1065_s9, %s1631_s4 }
 0x17a   : > { %p1067_p13 = pnand %p1066_p12, %p105_p2 }
 0x17c   : > { %p1068_p0 = pneg %p1067_p13 }
 0x17e   : > { %p1073_p3 = pnand %p1071_p1, %p1068_p0 }
 0x180   : > { %1076 = shalt.err (!%p1073_p3)
}
 0x181   : > { %976 = dma.vmem_to_hbm [thread:$0]  (%p105_p2), %s746_s5, 32, %s1631_s4, [#allocation5]  }
 0x182   : > { %1094 = dma.done.wait (%p105_p2), [#allocation5], 32  }
 0x183   : > { %1096 = vsyncadd (%p105_p2), [#allocation5], 4294967264 }
 0x184 PF: > { %p986_p5 = scmp.ge.s32.totalorder %s1115_s18, 2  ;;  %s761_s22 = sand.u32 1, %s1103_s15  }
 0x185   : > { %s762_s23 = scalar_lea.sflag [#allocation3], %s761_s22 }
 0x186   : > { %p981_p4 = pnand %p986_p5, %p1191_p6 }
 0x188   : > { %1098 = dma.done.wait (!%p981_p4), %s762_s23, 4096  }
 0x189   : > { %1100 = vsyncadd (!%p981_p4), %s762_s23, 4294963200  ;;  %p16_p7 = scmp.ge.s32.totalorder %s1172_s21, 4   ;;  %s1634_s15 = smov %s1107_s16 }
 0x18a   : > { %s1635_s16 = smov %s1111_s17  ;;  %s1636_s17 = smov %s1183_s24 }
 0x18b   : > { %s1637_s18 = smov %s1172_s21  ;;  %18 = sbr.rel (!%p16_p7) target bundleno = 4 (0x4), region = 79 }
 0x192   :  { %767 = vsyncpa [#allocation3], 1 }
 0x193   :  { %769 = vsyncpa [#allocation3 + $0x1], 1 }
 0x194   :  { %770 = vsyncpa [#allocation5], 1 }

</bundles_post_ra>
